<compile_context>
chip_gen: v7x
topology: tpu7x:2x2x1
jax: 0.10.0
libtpu: 0.0.40
codegen_flags: <defaults>
</compile_context>

<pallas_src>
import functools

import jax
import jax.numpy as jnp
from jax.experimental import pallas as pl
from jax.experimental.pallas import tpu as pltpu


def planning_kernel(s_ref, sp_ref, w1_ref, b1_ref, w2_ref, b2_ref,
                    wfa_ref, wfb_ref, bf_ref, w3_ref, b3_ref,
                    wh_ref, bh_ref, out_ref, *, nb_actions):
    f32 = jnp.float32
    bf16 = jnp.bfloat16

    # fc1 / fc2 (inputs already bf16 from the wrapper; f32 accumulation)
    x1 = jnp.dot(s_ref[...], w1_ref[...], preferred_element_type=f32) + b1_ref[...]
    x1 = jnp.maximum(x1, 0.0)
    x2 = jnp.dot(sp_ref[...], w2_ref[...], preferred_element_type=f32) + b2_ref[...]
    x2 = jnp.maximum(x2, 0.0)

    # fc on cat([x1, x2], -1) via split weight: x1 @ wf_a + x2 @ wf_b
    h = (jnp.dot(x1.astype(bf16), wfa_ref[...], preferred_element_type=f32)
         + jnp.dot(x2.astype(bf16), wfb_ref[...], preferred_element_type=f32)
         + bf_ref[...])
    h = jnp.maximum(h, 0.0)

    # fc3
    h = jnp.dot(h.astype(bf16), w3_ref[...], preferred_element_type=f32) + b3_ref[...]
    h = jnp.maximum(h, 0.0)

    # fused, lane-dense heads: one matmul -> [mu || sigma || zero-pad]
    z = jnp.dot(h.astype(bf16), wh_ref[...], preferred_element_type=f32) + bh_ref[...]

    lane = jax.lax.broadcasted_iota(jnp.int32, z.shape, dimension=1)
    mu = jnp.tanh(z)
    # numerically stable softplus (f32 on the EUP/VPU)
    sigma = jnp.maximum(z, 0.0) + jnp.log(1.0 + jnp.exp(-jnp.abs(z)))
    # full-width (multiple-of-128) store -> unmasked vst, no narrow writeback
    out_ref[...] = jnp.where(lane < nb_actions, mu, sigma)


def _choose_batch_tile(B, block_b):
    """Full batch for small B; otherwise 256-multiples with >=2 grid steps so
    the 'parallel' axis actually shards across v7x's two TensorCores."""
    if B <= 256:
        return B                       # block == full batch dim (always legal)
    half = -(-B // 2)                  # cdiv(B, 2)
    half = ((half + 255) // 256) * 256
    return min(block_b, half)


def planning_forward(s, s_, fused_params, nb_actions, block_b=1024):
    B, nb_states = s.shape
    out_pad = fused_params[-1].shape[-1]   # lane-padded head width (>=128)
    bf16 = jnp.bfloat16

    # Cast inputs to bf16 in the wrapper: halves the only per-step input DMA
    # and drops an in-kernel VPU cast (value is bf16 at the MXU anyway).
    s = s.astype(bf16)
    s_ = s_.astype(bf16)

    Bt = _choose_batch_tile(B, block_b)
    grid = (pl.cdiv(B, Bt),)

    def batch_spec(feat):
        return pl.BlockSpec((Bt, feat), lambda i: (i, 0))

    def resident_spec(arr):
        # weights/biases: same block every grid step -> stay VMEM-resident.
        # NOTE: default double-buffering of these tiny resident tensors is
        # ~0.2 MB total here; revisit (Buffered(1) / VMEM scratch) only if
        # hidden1/hidden2 grow enough to pressure the scoped VMEM limit.
        return pl.BlockSpec(arr.shape, lambda i: (0, 0))

    out = pl.pallas_call(
        functools.partial(planning_kernel, nb_actions=nb_actions),
        out_shape=jax.ShapeDtypeStruct((B, out_pad), jnp.float32),
        grid=grid,
        in_specs=[batch_spec(nb_states), batch_spec(nb_states)]
                 + [resident_spec(p) for p in fused_params],
        out_specs=batch_spec(out_pad),
        compiler_params=pltpu.CompilerParams(
            dimension_semantics=("parallel",)),
    )(s, s_, *fused_params)

    # cheap lane slices of the padded slab
    return out[:, :nb_actions], out[:, nb_actions:2 * nb_actions]


def init_linear(key, fan_in, fan_out):
    """PyTorch nn.Linear default init: U(-1/sqrt(fan_in), 1/sqrt(fan_in)).
    Weight returned already transposed to [in, out]; bias as [1, out]."""
    kw, kb = jax.random.split(key)
    bound = 1.0 / jnp.sqrt(jnp.asarray(fan_in, jnp.float32))
    w = jax.random.uniform(kw, (fan_in, fan_out), jnp.float32, -bound, bound)
    b = jax.random.uniform(kb, (1, fan_out), jnp.float32, -bound, bound)
    return w, b


def make_params(key, nb_states, nb_actions, hidden1, hidden2):
    keys = jax.random.split(key, 6)
    w1, b1 = init_linear(keys[0], nb_states, hidden1)       # fc1
    w2, b2 = init_linear(keys[1], nb_states, hidden1)       # fc2
    wf, bf = init_linear(keys[2], hidden1 * 2, hidden2)     # fc
    w3, b3 = init_linear(keys[3], hidden2, hidden2)         # fc3
    wmu, bmu = init_linear(keys[4], hidden2, nb_actions)    # mu_head
    wsg, bsg = init_linear(keys[5], hidden2, nb_actions)    # sigma_head
    return (w1, b1, w2, b2, wf, bf, w3, b3, wmu, bmu, wsg, bsg)


def make_fused_params(params, nb_states, nb_actions, hidden1, hidden2):
    """Host-side one-time fusion:
      - fc weight split along its input dim (wf_a, wf_b) so the in-kernel
        concat disappears and no zero-padded block-diagonal weight is needed,
      - mu/sigma heads fused and zero-padded to a lane-dense multiple of 128.
    Weights cast to bf16 (f32 accumulation in-kernel); biases stay f32."""
    w1, b1, w2, b2, wf, bf, w3, b3, wmu, bmu, wsg, bsg = params
    bf16 = jnp.bfloat16

    wfa = wf[:hidden1, :]
    wfb = wf[hidden1:, :]

    out_pad = max(128, ((2 * nb_actions + 127) // 128) * 128)
    wh = jnp.zeros((hidden2, out_pad), jnp.float32)
    wh = wh.at[:, :nb_actions].set(wmu)
    wh = wh.at[:, nb_actions:2 * nb_actions].set(wsg)
    bh = jnp.zeros((1, out_pad), jnp.float32)
    bh = bh.at[:, :nb_actions].set(bmu)
    bh = bh.at[:, nb_actions:2 * nb_actions].set(bsg)

    return (w1.astype(bf16), b1,
            w2.astype(bf16), b2,
            wfa.astype(bf16), wfb.astype(bf16), bf,
            w3.astype(bf16), b3,
            wh.astype(bf16), bh)


def planning_ref(s, s_, params):
    """Pure-JAX f32 reference mirroring the PyTorch forward."""
    w1, b1, w2, b2, wf, bf, w3, b3, wmu, bmu, wsg, bsg = params
    x = jax.nn.relu(s @ w1 + b1)
    x_ = jax.nn.relu(s_ @ w2 + b2)
    h = jax.nn.relu(jnp.concatenate([x, x_], axis=-1) @ wf + bf)
    h = jax.nn.relu(h @ w3 + b3)
    mu = jnp.tanh(h @ wmu + bmu)
    sigma = jax.nn.softplus(h @ wsg + bsg)
    return mu, sigma


if __name__ == "__main__":
    # Small shapes consistent with the module (nb_states, nb_actions, hidden1, hidden2)
    B, nb_states, nb_actions = 8, 32, 8
    hidden1, hidden2 = 128, 128

    key = jax.random.PRNGKey(0)
    k_s, k_sp, k_p = jax.random.split(key, 3)
    s = jax.random.normal(k_s, (B, nb_states), jnp.float32)
    s_ = jax.random.normal(k_sp, (B, nb_states), jnp.float32)

    params = make_params(k_p, nb_states, nb_actions, hidden1, hidden2)
    fused = make_fused_params(params, nb_states, nb_actions, hidden1, hidden2)

    fwd = jax.jit(functools.partial(planning_forward, nb_actions=nb_actions))
    mu, sigma = fwd(s, s_, fused)
    jax.block_until_ready((mu, sigma))

    # Correctness vs pure-f32 reference; tolerance loosened because kernel
    # weights + matmul inputs are bf16 (f32 accumulation keeps error well below this).
    mu_ref, sigma_ref = planning_ref(s, s_, params)
    assert jnp.allclose(mu, mu_ref, atol=5e-2, rtol=5e-2), "mu mismatch"
    assert jnp.allclose(sigma, sigma_ref, atol=5e-2, rtol=5e-2), "sigma mismatch"

    print("KERNEL_OK")
</pallas_src>

<mosaic_0001>
module attributes {stable_mosaic.version = 11 : i64} {
  func.func @planning_kernel(%arg0: i32, %arg1: memref<8x32xbf16, #tpu.memory_space<vmem>>, %arg2: memref<8x32xbf16, #tpu.memory_space<vmem>>, %arg3: memref<32x128xbf16, #tpu.memory_space<vmem>>, %arg4: memref<1x128xf32, #tpu.memory_space<vmem>>, %arg5: memref<32x128xbf16, #tpu.memory_space<vmem>>, %arg6: memref<1x128xf32, #tpu.memory_space<vmem>>, %arg7: memref<128x128xbf16, #tpu.memory_space<vmem>>, %arg8: memref<128x128xbf16, #tpu.memory_space<vmem>>, %arg9: memref<1x128xf32, #tpu.memory_space<vmem>>, %arg10: memref<128x128xbf16, #tpu.memory_space<vmem>>, %arg11: memref<1x128xf32, #tpu.memory_space<vmem>>, %arg12: memref<128x128xbf16, #tpu.memory_space<vmem>>, %arg13: memref<1x128xf32, #tpu.memory_space<vmem>>, %arg14: memref<8x128xf32, #tpu.memory_space<vmem>>) attributes {dimension_semantics = [#tpu.dimension_semantics<parallel>], iteration_bounds = array<i64: 1>, scalar_prefetch = 0 : i64, scratch_operands = 0 : i64, tpu.core_type = #tpu.core_type<tc>, window_params = [{transform_indices = @transform_0, window_bounds = array<i64: 8, 32>}, {transform_indices = @transform_1, window_bounds = array<i64: 8, 32>}, {pipeline_mode = #tpu.pipeline_mode<synchronous>, transform_indices = @transform_2, window_bounds = array<i64: 32, 128>}, {pipeline_mode = #tpu.pipeline_mode<synchronous>, transform_indices = @transform_3, window_bounds = array<i64: 1, 128>}, {pipeline_mode = #tpu.pipeline_mode<synchronous>, transform_indices = @transform_4, window_bounds = array<i64: 32, 128>}, {pipeline_mode = #tpu.pipeline_mode<synchronous>, transform_indices = @transform_5, window_bounds = array<i64: 1, 128>}, {pipeline_mode = #tpu.pipeline_mode<synchronous>, transform_indices = @transform_6, window_bounds = array<i64: 128, 128>}, {pipeline_mode = #tpu.pipeline_mode<synchronous>, transform_indices = @transform_7, window_bounds = array<i64: 128, 128>}, {pipeline_mode = #tpu.pipeline_mode<synchronous>, transform_indices = @transform_8, window_bounds = array<i64: 1, 128>}, {pipeline_mode = #tpu.pipeline_mode<synchronous>, transform_indices = @transform_9, window_bounds = array<i64: 128, 128>}, {pipeline_mode = #tpu.pipeline_mode<synchronous>, transform_indices = @transform_10, window_bounds = array<i64: 1, 128>}, {pipeline_mode = #tpu.pipeline_mode<synchronous>, transform_indices = @transform_11, window_bounds = array<i64: 128, 128>}, {pipeline_mode = #tpu.pipeline_mode<synchronous>, transform_indices = @transform_12, window_bounds = array<i64: 1, 128>}, {transform_indices = @transform_13, window_bounds = array<i64: 8, 128>}]} {
    %c0 = arith.constant 0 : index
    %c0_0 = arith.constant 0 : index
    %0 = vector.load %arg1[%c0, %c0_0] : memref<8x32xbf16, #tpu.memory_space<vmem>>, vector<8x32xbf16>
    %c0_1 = arith.constant 0 : index
    %c0_2 = arith.constant 0 : index
    %1 = vector.load %arg3[%c0_1, %c0_2] : memref<32x128xbf16, #tpu.memory_space<vmem>>, vector<32x128xbf16>
    %cst = arith.constant dense<0.000000e+00> : vector<8x128xf32>
    %2 = tpu.matmul %0, %1, %cst {dimension_numbers = #tpu.dot_dimension_numbers<[1], [0], [0], [1], [0, 0, 1, 1], [], []>} : vector<8x32xbf16>, vector<32x128xbf16>, vector<8x128xf32> -> vector<8x128xf32>
    %c0_3 = arith.constant 0 : index
    %c0_4 = arith.constant 0 : index
    %3 = vector.load %arg4[%c0_3, %c0_4] : memref<1x128xf32, #tpu.memory_space<vmem>>, vector<1x128xf32>
    %4 = vector.broadcast %3 : vector<1x128xf32> to vector<8x128xf32>
    %5 = arith.addf %2, %4 : vector<8x128xf32>
    %cst_5 = arith.constant 0.000000e+00 : f32
    %6 = vector.broadcast %cst_5 : f32 to vector<8x128xf32>
    %7 = arith.maximumf %5, %6 : vector<8x128xf32>
    %c0_6 = arith.constant 0 : index
    %c0_7 = arith.constant 0 : index
    %8 = vector.load %arg2[%c0_6, %c0_7] : memref<8x32xbf16, #tpu.memory_space<vmem>>, vector<8x32xbf16>
    %c0_8 = arith.constant 0 : index
    %c0_9 = arith.constant 0 : index
    %9 = vector.load %arg5[%c0_8, %c0_9] : memref<32x128xbf16, #tpu.memory_space<vmem>>, vector<32x128xbf16>
    %cst_10 = arith.constant dense<0.000000e+00> : vector<8x128xf32>
    %10 = tpu.matmul %8, %9, %cst_10 {dimension_numbers = #tpu.dot_dimension_numbers<[1], [0], [0], [1], [0, 0, 1, 1], [], []>} : vector<8x32xbf16>, vector<32x128xbf16>, vector<8x128xf32> -> vector<8x128xf32>
    %c0_11 = arith.constant 0 : index
    %c0_12 = arith.constant 0 : index
    %11 = vector.load %arg6[%c0_11, %c0_12] : memref<1x128xf32, #tpu.memory_space<vmem>>, vector<1x128xf32>
    %12 = vector.broadcast %11 : vector<1x128xf32> to vector<8x128xf32>
    %13 = arith.addf %10, %12 : vector<8x128xf32>
    %cst_13 = arith.constant 0.000000e+00 : f32
    %14 = vector.broadcast %cst_13 : f32 to vector<8x128xf32>
    %15 = arith.maximumf %13, %14 : vector<8x128xf32>
    %16 = arith.truncf %7 : vector<8x128xf32> to vector<8x128xbf16>
    %c0_14 = arith.constant 0 : index
    %c0_15 = arith.constant 0 : index
    %17 = vector.load %arg7[%c0_14, %c0_15] : memref<128x128xbf16, #tpu.memory_space<vmem>>, vector<128x128xbf16>
    %cst_16 = arith.constant dense<0.000000e+00> : vector<8x128xf32>
    %18 = tpu.matmul %16, %17, %cst_16 {dimension_numbers = #tpu.dot_dimension_numbers<[1], [0], [0], [1], [0, 0, 1, 1], [], []>} : vector<8x128xbf16>, vector<128x128xbf16>, vector<8x128xf32> -> vector<8x128xf32>
    %19 = arith.truncf %15 : vector<8x128xf32> to vector<8x128xbf16>
    %c0_17 = arith.constant 0 : index
    %c0_18 = arith.constant 0 : index
    %20 = vector.load %arg8[%c0_17, %c0_18] : memref<128x128xbf16, #tpu.memory_space<vmem>>, vector<128x128xbf16>
    %cst_19 = arith.constant dense<0.000000e+00> : vector<8x128xf32>
    %21 = tpu.matmul %19, %20, %cst_19 {dimension_numbers = #tpu.dot_dimension_numbers<[1], [0], [0], [1], [0, 0, 1, 1], [], []>} : vector<8x128xbf16>, vector<128x128xbf16>, vector<8x128xf32> -> vector<8x128xf32>
    %22 = arith.addf %18, %21 : vector<8x128xf32>
    %c0_20 = arith.constant 0 : index
    %c0_21 = arith.constant 0 : index
    %23 = vector.load %arg9[%c0_20, %c0_21] : memref<1x128xf32, #tpu.memory_space<vmem>>, vector<1x128xf32>
    %24 = vector.broadcast %23 : vector<1x128xf32> to vector<8x128xf32>
    %25 = arith.addf %22, %24 : vector<8x128xf32>
    %cst_22 = arith.constant 0.000000e+00 : f32
    %26 = vector.broadcast %cst_22 : f32 to vector<8x128xf32>
    %27 = arith.maximumf %25, %26 : vector<8x128xf32>
    %28 = arith.truncf %27 : vector<8x128xf32> to vector<8x128xbf16>
    %c0_23 = arith.constant 0 : index
    %c0_24 = arith.constant 0 : index
    %29 = vector.load %arg10[%c0_23, %c0_24] : memref<128x128xbf16, #tpu.memory_space<vmem>>, vector<128x128xbf16>
    %cst_25 = arith.constant dense<0.000000e+00> : vector<8x128xf32>
    %30 = tpu.matmul %28, %29, %cst_25 {dimension_numbers = #tpu.dot_dimension_numbers<[1], [0], [0], [1], [0, 0, 1, 1], [], []>} : vector<8x128xbf16>, vector<128x128xbf16>, vector<8x128xf32> -> vector<8x128xf32>
    %c0_26 = arith.constant 0 : index
    %c0_27 = arith.constant 0 : index
    %31 = vector.load %arg11[%c0_26, %c0_27] : memref<1x128xf32, #tpu.memory_space<vmem>>, vector<1x128xf32>
    %32 = vector.broadcast %31 : vector<1x128xf32> to vector<8x128xf32>
    %33 = arith.addf %30, %32 : vector<8x128xf32>
    %cst_28 = arith.constant 0.000000e+00 : f32
    %34 = vector.broadcast %cst_28 : f32 to vector<8x128xf32>
    %35 = arith.maximumf %33, %34 : vector<8x128xf32>
    %36 = arith.truncf %35 : vector<8x128xf32> to vector<8x128xbf16>
    %c0_29 = arith.constant 0 : index
    %c0_30 = arith.constant 0 : index
    %37 = vector.load %arg12[%c0_29, %c0_30] : memref<128x128xbf16, #tpu.memory_space<vmem>>, vector<128x128xbf16>
    %cst_31 = arith.constant dense<0.000000e+00> : vector<8x128xf32>
    %38 = tpu.matmul %36, %37, %cst_31 {dimension_numbers = #tpu.dot_dimension_numbers<[1], [0], [0], [1], [0, 0, 1, 1], [], []>} : vector<8x128xbf16>, vector<128x128xbf16>, vector<8x128xf32> -> vector<8x128xf32>
    %c0_32 = arith.constant 0 : index
    %c0_33 = arith.constant 0 : index
    %39 = vector.load %arg13[%c0_32, %c0_33] : memref<1x128xf32, #tpu.memory_space<vmem>>, vector<1x128xf32>
    %40 = vector.broadcast %39 : vector<1x128xf32> to vector<8x128xf32>
    %41 = arith.addf %38, %40 : vector<8x128xf32>
    %42 = tpu.iota {dimensions = array<i32: 1>} : vector<8x128xi32>
    %43 = math.tanh %41 : vector<8x128xf32>
    %cst_34 = arith.constant 0.000000e+00 : f32
    %44 = vector.broadcast %cst_34 : f32 to vector<8x128xf32>
    %45 = arith.maximumf %41, %44 : vector<8x128xf32>
    %46 = math.absf %41 : vector<8x128xf32>
    %cst_35 = arith.constant 0.000000e+00 : f32
    %47 = vector.broadcast %cst_35 : f32 to vector<8x128xf32>
    %48 = arith.subf %47, %46 : vector<8x128xf32>
    %49 = math.exp %48 : vector<8x128xf32>
    %cst_36 = arith.constant 1.000000e+00 : f32
    %50 = vector.broadcast %cst_36 : f32 to vector<8x128xf32>
    %51 = arith.addf %50, %49 : vector<8x128xf32>
    %52 = math.log %51 : vector<8x128xf32>
    %53 = arith.addf %45, %52 : vector<8x128xf32>
    %c8_i32 = arith.constant 8 : i32
    %54 = vector.broadcast %c8_i32 : i32 to vector<8x128xi32>
    %55 = arith.cmpi slt, %42, %54 : vector<8x128xi32>
    %56 = arith.select %55, %43, %53 : vector<8x128xi1>, vector<8x128xf32>
    %c0_37 = arith.constant 0 : index
    %c0_38 = arith.constant 0 : index
    %57 = vector.load %arg14[%c0_37, %c0_38] : memref<8x128xf32, #tpu.memory_space<vmem>>, vector<8x128xf32>
    tpu.vector_store %arg14[%c0_37, %c0_38], %56 {strides = array<i32>} : memref<8x128xf32, #tpu.memory_space<vmem>>, vector<8x128xf32>,
    return
  }
  func.func @transform_0(%arg0: i32) -> (i32, i32) {
    %c0_i32 = arith.constant 0 : i32
    %c0_i32_0 = arith.constant 0 : i32
    return %arg0, %c0_i32 : i32, i32
  }
  func.func @transform_1(%arg0: i32) -> (i32, i32) {
    %c0_i32 = arith.constant 0 : i32
    %c0_i32_0 = arith.constant 0 : i32
    return %arg0, %c0_i32 : i32, i32
  }
  func.func @transform_2(%arg0: i32) -> (i32, i32) {
    %c0_i32 = arith.constant 0 : i32
    %c0_i32_0 = arith.constant 0 : i32
    %c0_i32_1 = arith.constant 0 : i32
    return %c0_i32, %c0_i32_0 : i32, i32
  }
  func.func @transform_3(%arg0: i32) -> (i32, i32) {
    %c0_i32 = arith.constant 0 : i32
    %c0_i32_0 = arith.constant 0 : i32
    %c0_i32_1 = arith.constant 0 : i32
    return %c0_i32, %c0_i32_0 : i32, i32
  }
  func.func @transform_4(%arg0: i32) -> (i32, i32) {
    %c0_i32 = arith.constant 0 : i32
    %c0_i32_0 = arith.constant 0 : i32
    %c0_i32_1 = arith.constant 0 : i32
    return %c0_i32, %c0_i32_0 : i32, i32
  }
  func.func @transform_5(%arg0: i32) -> (i32, i32) {
    %c0_i32 = arith.constant 0 : i32
    %c0_i32_0 = arith.constant 0 : i32
    %c0_i32_1 = arith.constant 0 : i32
    return %c0_i32, %c0_i32_0 : i32, i32
  }
  func.func @transform_6(%arg0: i32) -> (i32, i32) {
    %c0_i32 = arith.constant 0 : i32
    %c0_i32_0 = arith.constant 0 : i32
    %c0_i32_1 = arith.constant 0 : i32
    return %c0_i32, %c0_i32_0 : i32, i32
  }
  func.func @transform_7(%arg0: i32) -> (i32, i32) {
    %c0_i32 = arith.constant 0 : i32
    %c0_i32_0 = arith.constant 0 : i32
    %c0_i32_1 = arith.constant 0 : i32
    return %c0_i32, %c0_i32_0 : i32, i32
  }
  func.func @transform_8(%arg0: i32) -> (i32, i32) {
    %c0_i32 = arith.constant 0 : i32
    %c0_i32_0 = arith.constant 0 : i32
    %c0_i32_1 = arith.constant 0 : i32
    return %c0_i32, %c0_i32_0 : i32, i32
  }
  func.func @transform_9(%arg0: i32) -> (i32, i32) {
    %c0_i32 = arith.constant 0 : i32
    %c0_i32_0 = arith.constant 0 : i32
    %c0_i32_1 = arith.constant 0 : i32
    return %c0_i32, %c0_i32_0 : i32, i32
  }
  func.func @transform_10(%arg0: i32) -> (i32, i32) {
    %c0_i32 = arith.constant 0 : i32
    %c0_i32_0 = arith.constant 0 : i32
    %c0_i32_1 = arith.constant 0 : i32
    return %c0_i32, %c0_i32_0 : i32, i32
  }
  func.func @transform_11(%arg0: i32) -> (i32, i32) {
    %c0_i32 = arith.constant 0 : i32
    %c0_i32_0 = arith.constant 0 : i32
    %c0_i32_1 = arith.constant 0 : i32
    return %c0_i32, %c0_i32_0 : i32, i32
  }
  func.func @transform_12(%arg0: i32) -> (i32, i32) {
    %c0_i32 = arith.constant 0 : i32
    %c0_i32_0 = arith.constant 0 : i32
    %c0_i32_1 = arith.constant 0 : i32
    return %c0_i32, %c0_i32_0 : i32, i32
  }
  func.func @transform_13(%arg0: i32) -> (i32, i32) {
    %c0_i32 = arith.constant 0 : i32
    %c0_i32_0 = arith.constant 0 : i32
    return %arg0, %c0_i32 : i32, i32
  }
}

</mosaic_0001>

<bundles_post_ra>
// kernel: planning_forward.1
= control target key start
LH: loop header
LB: loop body
LE: loop exit
PB: predicated region body
PF: predicated region fallthrough
CT: control target
= control target key end

     0   :  { %18 = vsyncpa [#allocation3], 0  ;;  %s1475_s0 = inlined_call_operand.vmem [shape: bf16[8,32], index: 0, kind: input, shape index: {}]   ;;  %s1476_s1 = inlined_call_operand.vmem [shape: bf16[8,32], index: 1, kind: input, shape index: {}]   ;;  %s1477_s2 = inlined_call_operand.hbm [shape: bf16[32,128], index: 2, kind: input, shape index: {}]   ;;  %s1478_s3 = inlined_call_operand.vmem [shape: f32[1,128], index: 3, kind: input, shape index: {}]   ;;  %s1479_s4 = inlined_call_operand.hbm [shape: bf16[32,128], index: 4, kind: input, shape index: {}]   ;;  %s1480_s5 = inlined_call_operand.hbm [shape: f32[1,128], index: 5, kind: input, shape index: {}]   ;;  %s1481_s6 = inlined_call_operand.hbm [shape: bf16[128,128], index: 6, kind: input, shape index: {}]   ;;  %s1482_s7 = inlined_call_operand.hbm [shape: bf16[128,128], index: 7, kind: input, shape index: {}]   ;;  %s1483_s8 = inlined_call_operand.hbm [shape: f32[1,128], index: 8, kind: input, shape index: {}]   ;;  %s1484_s9 = inlined_call_operand.hbm [shape: bf16[128,128], index: 9, kind: input, shape index: {}]   ;;  %s1485_s10 = inlined_call_operand.hbm [shape: f32[1,128], index: 10, kind: input, shape index: {}]   ;;  %s1486_s11 = inlined_call_operand.vmem [shape: bf16[128,128], index: 11, kind: input, shape index: {}]   ;;  %s1487_s12 = inlined_call_operand.vmem [shape: f32[1,128], index: 12, kind: input, shape index: {}]   ;;  %s1488_s13 = inlined_call_operand.vmem [shape: f32[8,128], index: 13, kind: output, shape index: {}]  }
   0x1   :  { %19 = vsyncpa [#allocation5], 0 }
   0x2   :  { %20 = vsyncpa [#allocation8], 0 }
   0x3   :  { %21 = vsyncpa [#allocation11], 0 }
   0x4   :  { %22 = vsyncpa [#allocation14], 0  ;;  %s1174_s25 = smov [#allocation4]   ;;  %s1175_s27 = smov [#allocation7]  }
   0x5   :  { %s46_s26 = sshll.u32 %s1174_s25, 4  ;;  %s68_s28 = sshll.u32 %s1175_s27, 4  ;;  %s47_s26 = int_to_ptr.vmem [resolvable:$true] %s46_s26  ;;  %s1256_s28 = int_to_ptr.vmem [resolvable:$true] %s68_s28 }
   0x6   :  { %s988_s14 = scalar_lea.hbm %s1479_s4, 256 }
   0x7   :  { %p989_p0 = scmp.ne.s32.totalorder %s1479_s4, %s988_s14  ;;  %p992_p1 = scmp.lt.u32.totalorder %s988_s14, %s1479_s4 }
   0x9   :  { %p994_p2 = pnand %p992_p1, %p989_p0 }
   0xb   :  { %997 = shalt.err (!%p994_p2)
}
   0xc   :  { %s998_s19 = scalar_lea.vmem %s47_s26, 256  ;;  %p1003_p4 = scmp.lt.s32.totalorder %s47_s26, %s47_s26 }
   0xd   :  { %p999_p3 = scmp.ne.s32.totalorder %s47_s26, %s998_s19  ;;  %p1004_p5 = scmp.lt.s32.totalorder %s998_s19, %s998_s19 }
   0xf   :  { %p1005_p6 = por %p1004_p5, %p1003_p4 }
  0x11   :  { %p1006_p7 = pnand %p1005_p6, %p999_p3 }
  0x13   :  { %1009 = shalt.err (!%p1006_p7)
}
  0x14   :  { %s1176_s20 = smov 64   ;;  %s1177_s21 = smov 4  }
  0x15   :  { %52 = dma.hbm_to_vmem [thread:$0]  %s1479_s4, 256, %s47_s26, [#allocation5], %s1176_s20, %s1176_s20, %s1177_s21  }
  0x16   :  { %s1010_s27 = scalar_lea.hbm %s1481_s6, 1024 }
  0x17   :  { %p1011_p8 = scmp.ne.s32.totalorder %s1481_s6, %s1010_s27  ;;  %p1014_p9 = scmp.lt.u32.totalorder %s1010_s27, %s1481_s6 }
  0x19   :  { %p1016_p10 = pnand %p1014_p9, %p1011_p8 }
  0x1b   :  { %1019 = shalt.err (!%p1016_p10)
}
  0x1c   :  { %s1020_s16 = scalar_lea.vmem %s1256_s28, 1024  ;;  %p1025_p12 = scmp.lt.s32.totalorder %s1256_s28, %s1256_s28 }
  0x1d   :  { %p1021_p11 = scmp.ne.s32.totalorder %s1256_s28, %s1020_s16  ;;  %p1026_p13 = scmp.lt.s32.totalorder %s1020_s16, %s1020_s16 }
  0x1f   :  { %p1027_p0 = por %p1026_p13, %p1025_p12 }
  0x21   :  { %p1028_p1 = pnand %p1027_p0, %p1021_p11 }
  0x23   :  { %1031 = shalt.err (!%p1028_p1)
}
  0x24   :  { %74 = dma.hbm_to_vmem [thread:$0]  %s1481_s6, 1024, %s1256_s28, [#allocation8], %s1176_s20, %s1176_s20, %s1177_s21  }
  0x25   :  { %s1178_s17 = smov [#allocation10]   ;;  %s1179_s19 = smov [#allocation2]  }
  0x26   :  { %s93_s18 = sshll.u32 %s1178_s17, 4  ;;  %s32_s22 = sshll.u32 %s1179_s19, 4  ;;  %s94_s18 = int_to_ptr.vmem [resolvable:$true] %s93_s18  ;;  %s1293_s22 = int_to_ptr.vmem [resolvable:$true] %s32_s22 }
  0x27   :  { %s1032_s25 = scalar_lea.hbm %s1483_s8, 16 }
  0x28   :  { %p1033_p2 = scmp.ne.s32.totalorder %s1483_s8, %s1032_s25  ;;  %p1036_p3 = scmp.lt.u32.totalorder %s1032_s25, %s1483_s8 }
  0x2a   :  { %p1038_p4 = pnand %p1036_p3, %p1033_p2 }
  0x2c   :  { %1041 = shalt.err (!%p1038_p4)
}
  0x2d   :  { %s1042_s6 = scalar_lea.vmem %s94_s18, 16  ;;  %s1046_s28 = scalar_lea.vmem %s94_s18, 32 }
  0x2e   :  { %p1043_p5 = scmp.ne.s32.totalorder %s94_s18, %s1042_s6  ;;  %p1047_p6 = scmp.lt.s32.totalorder %s94_s18, %s94_s18 }
  0x2f   :  { %p1048_p7 = scmp.lt.s32.totalorder %s1046_s28, %s1042_s6 }
  0x31   :  { %p1049_p8 = por %p1048_p7, %p1047_p6 }
  0x33   :  { %p1050_p9 = pnand %p1049_p8, %p1043_p5 }
  0x35   :  { %1053 = shalt.err (!%p1050_p9)
}
  0x36   :  { %96 = dma.hbm_to_vmem [thread:$0]  %s1483_s8, 16, %s94_s18, [#allocation11]  }
  0x37   :  { %s1054_s17 = scalar_lea.hbm %s1477_s2, 256 }
  0x38   :  { %p1055_p10 = scmp.ne.s32.totalorder %s1477_s2, %s1054_s17  ;;  %p1058_p11 = scmp.lt.u32.totalorder %s1054_s17, %s1477_s2 }
  0x3a   :  { %p1060_p12 = pnand %p1058_p11, %p1055_p10 }
  0x3c   :  { %1063 = shalt.err (!%p1060_p12)
}
  0x3d   :  { %s1064_s27 = scalar_lea.vmem %s1293_s22, 256  ;;  %p1069_p0 = scmp.lt.s32.totalorder %s1293_s22, %s1293_s22 }
  0x3e   :  { %p1065_p13 = scmp.ne.s32.totalorder %s1293_s22, %s1064_s27  ;;  %p1070_p1 = scmp.lt.s32.totalorder %s1064_s27, %s1064_s27 }
  0x40   :  { %p1071_p2 = por %p1070_p1, %p1069_p0 }
  0x42   :  { %p1072_p3 = pnand %p1071_p2, %p1065_p13 }
  0x44   :  { %1075 = shalt.err (!%p1072_p3)
}
  0x45   :  { %38 = dma.hbm_to_vmem [thread:$0]  %s1477_s2, 256, %s1293_s22, [#allocation3], %s1176_s20, %s1176_s20, %s1177_s21  }
  0x46   :  { %s1180_s29 = smov [#allocation6]   ;;  %s1181_s14 = smov [#allocation9]  }
  0x47   :  { %s59_s30 = sshll.u32 %s1180_s29, 4  ;;  %s80_s6 = sshll.u32 %s1181_s14, 4  ;;  %s60_s30 = int_to_ptr.vmem [resolvable:$true] %s59_s30  ;;  %s1327_s6 = int_to_ptr.vmem [resolvable:$true] %s80_s6 }
  0x48   :  { %s1076_s16 = scalar_lea.hbm %s1480_s5, 16 }
  0x49   :  { %p1077_p4 = scmp.ne.s32.totalorder %s1480_s5, %s1076_s16  ;;  %p1080_p5 = scmp.lt.u32.totalorder %s1076_s16, %s1480_s5 }
  0x4b   :  { %p1082_p6 = pnand %p1080_p5, %p1077_p4 }
  0x4d   :  { %1085 = shalt.err (!%p1082_p6)
}
  0x4e   :  { %s1086_s2 = scalar_lea.vmem %s60_s30, 16  ;;  %s1090_s22 = scalar_lea.vmem %s60_s30, 32 }
  0x4f   :  { %p1087_p7 = scmp.ne.s32.totalorder %s60_s30, %s1086_s2  ;;  %p1091_p8 = scmp.lt.s32.totalorder %s60_s30, %s60_s30 }
  0x50   :  { %p1092_p9 = scmp.lt.s32.totalorder %s1090_s22, %s1086_s2 }
  0x52   :  { %p1093_p10 = por %p1092_p9, %p1091_p8 }
  0x54   :  { %p1094_p11 = pnand %p1093_p10, %p1087_p7 }
  0x56   :  { %1097 = shalt.err (!%p1094_p11)
}
  0x57   :  { %62 = dma.hbm_to_vmem [thread:$0]  %s1480_s5, 16, %s60_s30, [#allocation5]  }
  0x58   :  { %s1098_s8 = scalar_lea.hbm %s1482_s7, 1024 }
  0x59   :  { %p1099_p12 = scmp.ne.s32.totalorder %s1482_s7, %s1098_s8  ;;  %p1102_p13 = scmp.lt.u32.totalorder %s1098_s8, %s1482_s7 }
  0x5b   :  { %p1104_p0 = pnand %p1102_p13, %p1099_p12 }
  0x5d   :  { %1107 = shalt.err (!%p1104_p0)
}
  0x5e   :  { %s1108_s15 = scalar_lea.vmem %s1327_s6, 1024  ;;  %p1113_p2 = scmp.lt.s32.totalorder %s1327_s6, %s1327_s6 }
  0x5f   :  { %p1109_p1 = scmp.ne.s32.totalorder %s1327_s6, %s1108_s15  ;;  %p1114_p3 = scmp.lt.s32.totalorder %s1108_s15, %s1108_s15 }
  0x61   :  { %p1115_p4 = por %p1114_p3, %p1113_p2 }
  0x63   :  { %p1116_p5 = pnand %p1115_p4, %p1109_p1 }
  0x65   :  { %1119 = shalt.err (!%p1116_p5)
}
  0x66   :  { %86 = dma.hbm_to_vmem [thread:$0]  %s1482_s7, 1024, %s1327_s6, [#allocation8], %s1176_s20, %s1176_s20, %s1177_s21  }
  0x67   :  { %s1182_s16 = smov [#allocation12]   ;;  %s1183_s26 = smov [#allocation13]  }
  0x68   :  { %s102_s4 = sshll.u32 %s1182_s16, 4  ;;  %s115_s17 = sshll.u32 %s1183_s26, 4  ;;  %s103_s4 = int_to_ptr.vmem [resolvable:$true] %s102_s4  ;;  %s116_s17 = int_to_ptr.vmem [resolvable:$true] %s115_s17 }
  0x69   :  { %s1120_s22 = scalar_lea.hbm %s1484_s9, 1024 }
  0x6a   :  { %p1121_p6 = scmp.ne.s32.totalorder %s1484_s9, %s1120_s22  ;;  %p1124_p7 = scmp.lt.u32.totalorder %s1120_s22, %s1484_s9 }
  0x6c   :  { %p1126_p8 = pnand %p1124_p7, %p1121_p6 }
  0x6e   :  { %1129 = shalt.err (!%p1126_p8)
}
  0x6f   :  { %s1130_s7 = scalar_lea.vmem %s103_s4, 1024  ;;  %p1135_p10 = scmp.lt.s32.totalorder %s103_s4, %s103_s4 }
  0x70   :  { %p1131_p9 = scmp.ne.s32.totalorder %s103_s4, %s1130_s7  ;;  %p1136_p11 = scmp.lt.s32.totalorder %s1130_s7, %s1130_s7 }
  0x72   :  { %p1137_p12 = por %p1136_p11, %p1135_p10 }
  0x74   :  { %p1138_p13 = pnand %p1137_p12, %p1131_p9 }
  0x76   :  { %1141 = shalt.err (!%p1138_p13)
}
  0x77   :  { %108 = dma.hbm_to_vmem [thread:$0]  %s1484_s9, 1024, %s103_s4, [#allocation11], %s1176_s20, %s1176_s20, %s1177_s21  }
  0x78   :  { %s1142_s14 = scalar_lea.hbm %s1485_s10, 16 }
  0x79   :  { %p1143_p0 = scmp.ne.s32.totalorder %s1485_s10, %s1142_s14  ;;  %p1146_p1 = scmp.lt.u32.totalorder %s1142_s14, %s1485_s10 }
  0x7b   :  { %p1148_p2 = pnand %p1146_p1, %p1143_p0 }
  0x7d   :  { %1151 = shalt.err (!%p1148_p2)
}
  0x7e   :  { %s1152_s16 = scalar_lea.vmem %s116_s17, 16  ;;  %s1156_s26 = scalar_lea.vmem %s116_s17, 32 }
  0x7f   :  { %p1153_p3 = scmp.ne.s32.totalorder %s116_s17, %s1152_s16  ;;  %p1157_p4 = scmp.lt.s32.totalorder %s116_s17, %s116_s17 }
  0x80   :  { %p1158_p5 = scmp.lt.s32.totalorder %s1156_s26, %s1152_s16 }
  0x82   :  { %p1159_p6 = por %p1158_p5, %p1157_p4 }
  0x84   :  { %p1160_p7 = pnand %p1159_p6, %p1153_p3 }
  0x86   :  { %1163 = shalt.err (!%p1160_p7)
}
  0x87   :  { %118 = dma.hbm_to_vmem [thread:$0]  %s1485_s10, 16, %s116_s17, [#allocation14]  }
  0x88   :  { %1164 = dma.done.wait [#allocation3], 256  }
  0x89   :  { %1165 = vsyncadd [#allocation3], 4294967040 }
  0x8a   :  { %1166 = dma.done.wait [#allocation5], 272  }
  0x8b   :  { %1167 = vsyncadd [#allocation5], 4294967024 }
  0x8c   :  { %1168 = dma.done.wait [#allocation8], 2048  }
  0x8d   :  { %1169 = vsyncadd [#allocation8], 4294965248 }
  0x8e   :  { %1170 = dma.done.wait [#allocation11], 1040  }
  0x8f   :  { %1171 = vsyncadd [#allocation11], 4294966256 }
  0x90   :  { %1172 = dma.done.wait [#allocation14], 16  }
  0x91   :  { %1173 = vsyncadd [#allocation14], 4294967280  ;;  %v1184_v0 = vmov 0.0   ;;  %vm1185_vm0 = vmmov 0   ;;  %v946_v1 = vld [vmem:[#allocation2] sm:$0xff]   ;;  %v947_v2 = vld [vmem:[#allocation4] sm:$0xff]  }
  0x92   :  { %838 = vmatprep.subr.bf16.mxu0 %v1184_v0  ;;  %846 = vmatprep.subr.bf16.mxu1 %v1184_v0  ;;  %v948_v3 = vld [vmem:[#allocation2 + $0x8] sm:$0xff]   ;;  %v949_v4 = vld [vmem:[#allocation4 + $0x8] sm:$0xff]   ;;  %vm172_vm1 = vcmask 261120   ;;  %v757_v24 = vld [vmem:[#allocation6] ss:$0 sm:$0xff] }
  0x93   :  { %842 = vmatprep.mubr.msk.bf16.mxu0 %vm1185_vm0, %v1184_v0  ;;  %850 = vmatprep.mubr.msk.bf16.mxu1 %vm1185_vm0, %v1184_v0  ;;  %v148_v5 = vld [vmem:[%s1475_s0] sm:$0xf]  ;;  %v950_v7 = vld [vmem:[#allocation9] sm:$0xff]   ;;  %v952_v9 = vld [vmem:[#allocation9 + $0x8] sm:$0xff]  }
  0x94   :  { %839 = vmatpush3.bf16.msra.mxu0 %v946_v1  ;;  %847 = vmatpush3.bf16.msra.mxu1 %v947_v2  ;;  %v217_v6 = vld [vmem:[%s1476_s1] sm:$0xf]  ;;  %v951_v8 = vld [vmem:[#allocation7] sm:$0xff]   ;;  %v953_v10 = vld [vmem:[#allocation7 + $0x8] sm:$0xff]  }
  0x95   :  { %840 = vmatprep.subr.bf16.mxu0 %v1184_v0  ;;  %848 = vmatprep.subr.bf16.mxu1 %v1184_v0  ;;  %v954_v11 = vld [vmem:[#allocation9 + $0x10] sm:$0xff]   ;;  %v956_v13 = vld [vmem:[#allocation9 + $0x18] sm:$0xff]   ;;  %v958_v15 = vld [vmem:[#allocation9 + $0x20] sm:$0xff]  }
  0x96   :  { %v955_v12 = vld [vmem:[#allocation7 + $0x10] sm:$0xff]   ;;  %v957_v14 = vld [vmem:[#allocation7 + $0x18] sm:$0xff]   ;;  %v959_v16 = vld [vmem:[#allocation7 + $0x20] sm:$0xff]  }
  0x97   :  { %v960_v17 = vld [vmem:[#allocation9 + $0x28] sm:$0xff]   ;;  %v962_v19 = vld [vmem:[#allocation9 + $0x30] sm:$0xff]   ;;  %v964_v21 = vld [vmem:[#allocation9 + $0x38] sm:$0xff]  }
  0x98   :  { %841 = vmatpush3.bf16.msra.mxu0 %v948_v3  ;;  %849 = vmatpush3.bf16.msra.mxu1 %v949_v4  ;;  %v961_v18 = vld [vmem:[#allocation7 + $0x28] sm:$0xff]   ;;  %v963_v20 = vld [vmem:[#allocation7 + $0x30] sm:$0xff]   ;;  %v965_v22 = vld [vmem:[#allocation7 + $0x38] sm:$0xff]  }
  0x99   :  { %854 = vmatprep.subr.bf16.mxu0 %v1184_v0  ;;  %874 = vmatprep.subr.bf16.mxu1 %v1184_v0  ;;  %v753_v23 = vld [vmem:[%s1478_s3] ss:$0 sm:$0xff]  ;;  %v966_v38 = vld [vmem:[#allocation12] sm:$0xff]   ;;  %v967_v40 = vld [vmem:[#allocation12 + $0x8] sm:$0xff]  }
  0x9a   :  { %v968_v41 = vld [vmem:[#allocation12 + $0x10] sm:$0xff]   ;;  %v969_v42 = vld [vmem:[#allocation12 + $0x18] sm:$0xff]   ;;  %v970_v43 = vld [vmem:[#allocation12 + $0x20] sm:$0xff]  }
  0x9b   :  { %843 = vmatmul.mubr.msk.bf16.vlgmr.msra.gmra.mrb[0].mxu0 %vm172_vm1, %v148_v5  ;;  %851 = vmatmul.mubr.msk.bf16.vlgmr.msra.gmra.mrb[0].mxu1 %vm172_vm1, %v217_v6  ;;  %v971_v44 = vld [vmem:[#allocation12 + $0x28] sm:$0xff]   ;;  %v972_v45 = vld [vmem:[#allocation12 + $0x30] sm:$0xff]   ;;  %v973_v46 = vld [vmem:[#allocation12 + $0x38] sm:$0xff]  }
  0x9c   :  { %855 = vmatpush3.bf16.msra.mxu0 %v950_v7  ;;  %875 = vmatpush3.bf16.msra.mxu1 %v951_v8  ;;  %v974_v47 = vld [vmem:[%s1486_s11] sm:$0xff]   ;;  %v975_v48 = vld [vmem:[%s1486_s11 + $0x8] sm:$0xff]   ;;  %v976_v49 = vld [vmem:[%s1486_s11 + $0x10] sm:$0xff]  }
  0x9d   :  { %856 = vmatprep.subr.bf16.mxu0 %v1184_v0  ;;  %876 = vmatprep.subr.bf16.mxu1 %v1184_v0  ;;  %v977_v50 = vld [vmem:[%s1486_s11 + $0x18] sm:$0xff]   ;;  %v978_v51 = vld [vmem:[%s1486_s11 + $0x20] sm:$0xff]   ;;  %v979_v52 = vld [vmem:[%s1486_s11 + $0x28] sm:$0xff]  }
  0x9e   :  { %870 = vmatprep.mubr.msk.bf16.mxu0 %vm1185_vm0, %v1184_v0  ;;  %890 = vmatprep.mubr.msk.bf16.mxu1 %vm1185_vm0, %v1184_v0  ;;  %v777_v55 = vld [vmem:[#allocation10] ss:$0 sm:$0xff]  ;;  %v980_v3 = vld [vmem:[%s1486_s11 + $0x30] sm:$0xff]   ;;  %v981_v4 = vld [vmem:[%s1486_s11 + $0x38] sm:$0xff]  }
  0x9f   :  { %v778_v5 = vld [vmem:[#allocation13] ss:$0 sm:$0xff] }
  0xa0   :  { %857 = vmatpush3.bf16.msra.mxu0 %v952_v9  ;;  %877 = vmatpush3.bf16.msra.mxu1 %v953_v10 }
  0xa1   :  { %858 = vmatprep.subr.bf16.mxu0 %v1184_v0  ;;  %878 = vmatprep.subr.bf16.mxu1 %v1184_v0 }
  0xa4   :  { %859 = vmatpush3.bf16.msra.mxu0 %v954_v11  ;;  %879 = vmatpush3.bf16.msra.mxu1 %v955_v12 }
  0xa5   :  { %860 = vmatprep.subr.bf16.mxu0 %v1184_v0  ;;  %880 = vmatprep.subr.bf16.mxu1 %v1184_v0 }
  0xa8   :  { %861 = vmatpush3.bf16.msra.mxu0 %v956_v13  ;;  %881 = vmatpush3.bf16.msra.mxu1 %v957_v14  ;;  %v787_v13 = vld [vmem:[%s1487_s12] ss:$0 sm:$0xff] }
  0xa9   :  { %862 = vmatprep.subr.bf16.mxu0 %v1184_v0  ;;  %882 = vmatprep.subr.bf16.mxu1 %v1184_v0 }
  0xac   :  { %863 = vmatpush3.bf16.msra.mxu0 %v958_v15  ;;  %883 = vmatpush3.bf16.msra.mxu1 %v959_v16 }
  0xad   :  { %864 = vmatprep.subr.bf16.mxu0 %v1184_v0  ;;  %884 = vmatprep.subr.bf16.mxu1 %v1184_v0 }
  0xb0   :  { %865 = vmatpush3.bf16.msra.mxu0 %v960_v17  ;;  %885 = vmatpush3.bf16.msra.mxu1 %v961_v18 }
  0xb1   :  { %866 = vmatprep.subr.bf16.mxu0 %v1184_v0  ;;  %886 = vmatprep.subr.bf16.mxu1 %v1184_v0 }
  0xb4   :  { %867 = vmatpush3.bf16.msra.mxu0 %v962_v19  ;;  %887 = vmatpush3.bf16.msra.mxu1 %v963_v20 }
  0xb5   :  { %868 = vmatprep.subr.bf16.mxu0 %v1184_v0  ;;  %888 = vmatprep.subr.bf16.mxu1 %v1184_v0 }
  0xb8   :  { %869 = vmatpush3.bf16.msra.mxu0 %v964_v21  ;;  %889 = vmatpush3.bf16.msra.mxu1 %v965_v22 }
  0xb9   :  { %894 = vmatprep.subr.bf16.mxu0 %v1184_v0  ;;  %914 = vmatprep.subr.bf16.mxu1 %v1184_v0 }
 0x16e   :  { %v210_v25 = vpop.f32.mrb[0].mxu0  ;;  %v278_v27 = vpop.f32.mrb[0].mxu1 }
 0x16f   :  { %v211_v26 = vadd.f32 %v753_v23, %v210_v25  ;;  %v844_v28 = vpop.f32.mrb[1].mxu0  ;;  %v279_v29 = vadd.f32 %v757_v24, %v278_v27  ;;  %v852_v30 = vpop.f32.mrb[1].mxu1  ;;  %v729_v23 = vlaneseq }
 0x170   :  { %v213_v31 = vpop.f32.mrb[2].mxu0  ;;  %v281_v33 = vpop.f32.mrb[2].mxu1 }
 0x171   :  { %v216_v32 = vmax.f32 %v211_v26, 0.0  ;;  %v845_v34 = vpop.f32.mrb[3].mxu0  ;;  %v284_v35 = vmax.f32 %v279_v29, 0.0  ;;  %v853_v36 = vpop.f32.mrb[3].mxu1  ;;  %v730_v24 = vand.u32 127, %v729_v23 }
 0x173   :  { %v285_v37 = vpack.c.bf16 %v216_v32, %v216_v32  ;;  %v302_v39 = vpack.c.bf16 %v284_v35, %v284_v35  ;;  %vm741_vm2 = vcmp.lt.s32.totalorder %v730_v24, 8 }
 0x175   :  { %891 = vmatmul.mubr.bf16.vlgmr.msra.gmra.mrb[4].mxu1 %v285_v37  ;;  %871 = vmatmul.mubr.bf16.vlgmr.msra.gmra.mrb[4].mxu0 %v302_v39 }
 0x176   :  { %930 = vmatprep.mubr.msk.bf16.mxu1 %vm1185_vm0, %v1184_v0  ;;  %895 = vmatpush3.bf16.msra.mxu0 %v966_v38 }
 0x177   :  { %910 = vmatprep.mubr.msk.bf16.mxu0 %vm1185_vm0, %v1184_v0  ;;  %896 = vmatprep.subr.bf16.mxu0 %v1184_v0 }
 0x178   :  { %915 = vmatpush3.bf16.msra.mxu1 %v974_v47 }
 0x179   :  { %916 = vmatprep.subr.bf16.mxu1 %v1184_v0 }
 0x17a   :  { %897 = vmatpush3.bf16.msra.mxu0 %v967_v40 }
 0x17b   :  { %898 = vmatprep.subr.bf16.mxu0 %v1184_v0 }
 0x17c   :  { %917 = vmatpush3.bf16.msra.mxu1 %v975_v48 }
 0x17d   :  { %918 = vmatprep.subr.bf16.mxu1 %v1184_v0 }
 0x17e   :  { %899 = vmatpush3.bf16.msra.mxu0 %v968_v41 }
 0x17f   :  { %900 = vmatprep.subr.bf16.mxu0 %v1184_v0 }
 0x180   :  { %919 = vmatpush3.bf16.msra.mxu1 %v976_v49 }
 0x181   :  { %920 = vmatprep.subr.bf16.mxu1 %v1184_v0 }
 0x182   :  { %901 = vmatpush3.bf16.msra.mxu0 %v969_v42 }
 0x183   :  { %902 = vmatprep.subr.bf16.mxu0 %v1184_v0 }
 0x184   :  { %921 = vmatpush3.bf16.msra.mxu1 %v977_v50 }
 0x185   :  { %922 = vmatprep.subr.bf16.mxu1 %v1184_v0 }
 0x186   :  { %903 = vmatpush3.bf16.msra.mxu0 %v970_v43 }
 0x187   :  { %904 = vmatprep.subr.bf16.mxu0 %v1184_v0 }
 0x188   :  { %923 = vmatpush3.bf16.msra.mxu1 %v978_v51 }
 0x189   :  { %924 = vmatprep.subr.bf16.mxu1 %v1184_v0 }
 0x18a   :  { %905 = vmatpush3.bf16.msra.mxu0 %v971_v44 }
 0x18b   :  { %906 = vmatprep.subr.bf16.mxu0 %v1184_v0 }
 0x18c   :  { %925 = vmatpush3.bf16.msra.mxu1 %v979_v52 }
 0x18d   :  { %926 = vmatprep.subr.bf16.mxu1 %v1184_v0 }
 0x18e   :  { %907 = vmatpush3.bf16.msra.mxu0 %v972_v45 }
 0x18f   :  { %908 = vmatprep.subr.bf16.mxu0 %v1184_v0 }
 0x190   :  { %927 = vmatpush3.bf16.msra.mxu1 %v980_v3 }
 0x191   :  { %928 = vmatprep.subr.bf16.mxu1 %v1184_v0 }
 0x192   :  { %909 = vmatpush3.bf16.msra.mxu0 %v973_v46 }
 0x194   :  { %929 = vmatpush3.bf16.msra.mxu1 %v981_v4 }
 0x248   :  { %v489_v53 = vpop.f32.mrb[4].mxu1  ;;  %v401_v54 = vpop.f32.mrb[4].mxu0 }
 0x249   :  { %v892_v56 = vpop.f32.mrb[5].mxu1  ;;  %v490_v57 = vadd.f32 %v489_v53, %v401_v54  ;;  %v872_v58 = vpop.f32.mrb[5].mxu0 }
 0x24a   :  { %v492_v59 = vpop.f32.mrb[6].mxu1  ;;  %v404_v60 = vpop.f32.mrb[6].mxu0 }
 0x24b   :  { %v893_v61 = vpop.f32.mrb[7].mxu1  ;;  %v502_v62 = vadd.f32 %v777_v55, %v490_v57  ;;  %v873_v63 = vpop.f32.mrb[7].mxu0 }
 0x24d   :  { %v503_v1 = vmax.f32 %v502_v62, 0.0 }
 0x24f   :  { %v504_v2 = vpack.c.bf16 %v503_v1, %v503_v1 }
 0x251   :  { %911 = vmatmul.mubr.bf16.vlgmr.msra.gmra.mrb[8].mxu0 %v504_v2 }
 0x324   :  { %v610_v6 = vpop.f32.mrb[8].mxu0 }
 0x325   :  { %v611_v7 = vadd.f32 %v778_v5, %v610_v6  ;;  %v912_v8 = vpop.f32.mrb[9].mxu0 }
 0x326   :  { %v613_v9 = vpop.f32.mrb[10].mxu0 }
 0x327   :  { %v616_v10 = vmax.f32 %v611_v7, 0.0  ;;  %v913_v11 = vpop.f32.mrb[11].mxu0 }
 0x329   :  { %v617_v12 = vpack.c.bf16 %v616_v10, %v616_v10 }
 0x32b   :  { %931 = vmatmul.mubr.bf16.vlgmr.msra.gmra.mrb[8].mxu1 %v617_v12 }
 0x3fe   :  { %v723_v14 = vpop.f32.mrb[8].mxu1 }
 0x3ff   :  { %v724_v0 = vadd.f32 %v787_v13, %v723_v14  ;;  %v932_v15 = vpop.f32.mrb[9].mxu1 }
 0x400   :  { %v726_v16 = vpop.f32.mrb[10].mxu1 }
 0x401   :  { %v733_v17 = vand.u32 2147483647, %v724_v0  ;;  %v933_v18 = vpop.f32.mrb[11].mxu1  ;;  %v732_v26 = vmax.f32 %v724_v0, 0.0 }
 0x403   :  { %v734_v19 = vsub.f32 0.0, %v733_v17 }
 0x405   :  { %v735_v20 = vmul.f32 1.442695, %v734_v19 }
 0x407   :  { %982 = vpow2.f32 %v735_v20 }
 0x411   :  { %v983_v21 = vpop.eup %982 }
 0x412   :  { %v737_v22 = vadd.f32 1.0, %v983_v21 }
 0x414   :  { %984 = vlog2.f32 %v737_v22 }
 0x415   :  { %986 = vtanh.f32 %v724_v0 }
 0x41e   :  { %v985_v25 = vpop.eup %984 }
 0x41f   :  { %v739_v27 = vmul.f32 0.6931472, %v985_v25  ;;  %v987_v29 = vpop.eup %986 }
 0x421   :  { %v740_v28 = vadd.f32 %v739_v27, %v732_v26 }
 0x423   :  { %v742_v30 = vsel %vm741_vm2, %v987_v29, %v740_v28 }
 0x424   :  { %743 = vst [vmem:[%s1488_s13] sm:$0xff] %v742_v30 }
 0x425   :  { %748 = vsyncpa [#allocation3], 1 }
 0x426   :  { %749 = vsyncpa [#allocation5], 1 }
 0x427   :  { %750 = vsyncpa [#allocation8], 1 }
 0x428   :  { %751 = vsyncpa [#allocation11], 1 }
 0x429   :  { %752 = vsyncpa [#allocation14], 1 }

</bundles_post_ra>
